<compile_context>
chip_gen: v7x
topology: tpu7x:2x2x1
jax: 0.10.0
libtpu: 0.0.40
codegen_flags: <defaults>
</compile_context>

<pallas_src>
import math

import jax
import jax.numpy as jnp
from jax.experimental import pallas as pl
from jax.experimental.pallas import tpu as pltpu


def _round_up(x, m):
    return ((x + m - 1) // m) * m


def _vmem_budget_bytes():
    """Per-generation scoped-VMEM budget: ~3/4 of physical VMEM per TensorCore."""
    cap = 64 * 1024 * 1024  # conservative v7x-sized fallback
    try:
        got = getattr(pltpu.get_tpu_info(), "vmem_capacity_bytes", None)
        if isinstance(got, (int, float)) and got > 0:
            cap = int(got)
    except Exception:
        pass
    return cap * 3 // 4  # ~48 MiB on v7x (64 MiB), ~96 MiB on v5e/v6e (128 MiB)


def _tile_candidates(dim, max_tile):
    """Multiples of 128 that evenly divide `dim` (dim is a 128 multiple)."""
    return sorted(
        {t for t in range(128, min(dim, max_tile) + 1, 128) if dim % t == 0},
        reverse=True,
    )


def _pick_tile(dim, fits, *, extra_parallel=1, max_tile=1024):
    """Largest fitting tile; prefer tiles leaving >= 2 parallel grid steps (v7x)."""
    fitting = [t for t in _tile_candidates(dim, max_tile) if fits(t)]
    if not fitting:
        return None
    pref = [t for t in fitting if extra_parallel * (dim // t) >= 2]
    return (pref or fitting)[0]


# ----------------------------- kernel bodies ---------------------------------


def _support_kernel(x_ref, w_ref, s_ref):
    # x_ref: [TM, fin_pad], w_ref: [fin_pad, fout_pad] (resident), s_ref: [TM, fout_pad].
    s_ref[...] = jnp.dot(
        x_ref[...], w_ref[...], preferred_element_type=jnp.float32
    ).astype(s_ref.dtype)


def _support_kernel_ktiled(x_ref, w_ref, s_ref, acc_ref):
    # Fallback when fin_pad * fout_pad is too large for a single K block.
    @pl.when(pl.program_id(1) == 0)
    def _():
        acc_ref[...] = jnp.zeros_like(acc_ref)

    acc_ref[...] += jnp.dot(x_ref[...], w_ref[...],
                            preferred_element_type=jnp.float32)

    @pl.when(pl.program_id(1) == pl.num_programs(1) - 1)
    def _():
        s_ref[...] = acc_ref[...].astype(s_ref.dtype)


def _aggregate_kernel(adj_ref, s_ref, b_ref, o_ref):
    # adj_ref: [1, TM, n_pad] (streamed), s_ref: [1, n_pad, fout_pad] (resident
    # per batch), b_ref: [1, fout_pad], o_ref: [1, TM, fout_pad].
    o_ref[0] = (
        jnp.dot(adj_ref[0], s_ref[0], preferred_element_type=jnp.float32)
        + b_ref[...]
    ).astype(o_ref.dtype)


def _aggregate_kernel_ktiled(adj_ref, s_ref, b_ref, o_ref, acc_ref):
    # Fallback for very large n_pad: adj streamed as (TM, TK) tiles, f32 acc.
    k = pl.program_id(2)

    @pl.when(k == 0)
    def _():
        acc_ref[...] = jnp.zeros_like(acc_ref)

    acc_ref[...] += jnp.dot(adj_ref[0], s_ref[0],
                            preferred_element_type=jnp.float32)

    @pl.when(k == pl.num_programs(2) - 1)
    def _():
        o_ref[0] = (acc_ref[...] + b_ref[...]).astype(o_ref.dtype)


# ------------------------------- wrapper --------------------------------------


def graph_convolution(x, adj, weight, bias):
    """GCN forward: adj @ (x @ weight) + bias.

    x: [B, N, Fin], adj: [B, N, N], weight: [Fin, Fout], bias: [Fout] or None.
    Returns [B, N, Fout] in x.dtype.  Full f32 math (PyTorch semantics).
    """
    B, N, Fin = x.shape
    Fout = weight.shape[1]
    out_dtype = x.dtype
    out_bytes = jnp.dtype(out_dtype).itemsize
    f32b = 4

    budget = _vmem_budget_bytes()

    # ---- minimal 128-granular padding (no dtype cast of adj) ------------------
    n_pad = _round_up(N, 128)
    fin_pad = _round_up(Fin, 128)
    fout_pad = _round_up(Fout, 128)

    x_p = x if (N == n_pad and Fin == fin_pad) else jnp.pad(
        x, ((0, 0), (0, n_pad - N), (0, fin_pad - Fin)))
    adj_p = adj if N == n_pad else jnp.pad(
        adj, ((0, 0), (0, n_pad - N), (0, n_pad - N)))
    w_p = weight if (Fin == fin_pad and Fout == fout_pad) else jnp.pad(
        weight, ((0, fin_pad - Fin), (0, fout_pad - Fout)))
    if bias is None:
        # TODO(synk): bias=False path still adds an explicit zero vector in the
        # final store (one broadcast add per output tile; negligible).
        b_p = jnp.zeros((1, fout_pad), dtype=jnp.float32)
    else:
        b1 = bias if Fout == fout_pad else jnp.pad(bias, (0, fout_pad - Fout))
        b_p = b1.astype(jnp.float32).reshape(1, fout_pad)

    adj_bytes = jnp.dtype(adj_p.dtype).itemsize
    x_bytes = jnp.dtype(x_p.dtype).itemsize

    # ---- kernel 1: support = X @ W, with B*n_pad folded into M ----------------
    m_dim = B * n_pad
    x2d = x_p.reshape(m_dim, fin_pad)

    def fits_support_fullk(tm):
        # 2x for double-buffering; W gets its own (skipped-refetch) buffers too.
        return 2 * (tm * fin_pad * x_bytes
                    + fin_pad * fout_pad * f32b
                    + tm * fout_pad * f32b) <= budget

    tm_s = _pick_tile(m_dim, fits_support_fullk, extra_parallel=1, max_tile=1024)

    if tm_s is not None:
        support2d = pl.pallas_call(
            _support_kernel,
            out_shape=jax.ShapeDtypeStruct((m_dim, fout_pad), jnp.float32),
            grid_spec=pltpu.PrefetchScalarGridSpec(
                num_scalar_prefetch=0,
                grid=(m_dim // tm_s,),
                in_specs=[
                    pl.BlockSpec((tm_s, fin_pad), lambda m: (m, 0)),
                    pl.BlockSpec((fin_pad, fout_pad), lambda m: (0, 0)),  # resident W
                ],
                out_specs=pl.BlockSpec((tm_s, fout_pad), lambda m: (m, 0)),
            ),
            compiler_params=pltpu.CompilerParams(
                dimension_semantics=("parallel",),
                vmem_limit_bytes=budget,
            ),
            cost_estimate=pl.CostEstimate(
                flops=2 * m_dim * fin_pad * fout_pad,
                transcendentals=0,
                bytes_accessed=(m_dim * fin_pad * x_bytes
                                + fin_pad * fout_pad * f32b
                                + m_dim * fout_pad * f32b),
            ),
        )(x2d, w_p)
    else:
        # K-tiled fallback for very large Fin*Fout.
        def fits_support_kt(tm, tk):
            return (2 * (tm * tk * x_bytes + tk * fout_pad * f32b
                         + tm * fout_pad * f32b)
                    + tm * fout_pad * f32b) <= budget

        tk_s = _pick_tile(fin_pad, lambda t: fits_support_kt(128, t),
                          extra_parallel=1, max_tile=4096) or 128
        tm_s = _pick_tile(m_dim, lambda t: fits_support_kt(t, tk_s),
                          extra_parallel=1, max_tile=1024) or 128

        support2d = pl.pallas_call(
            _support_kernel_ktiled,
            out_shape=jax.ShapeDtypeStruct((m_dim, fout_pad), jnp.float32),
            grid_spec=pltpu.PrefetchScalarGridSpec(
                num_scalar_prefetch=0,
                grid=(m_dim // tm_s, fin_pad // tk_s),
                in_specs=[
                    pl.BlockSpec((tm_s, tk_s), lambda m, k: (m, k)),
                    pl.BlockSpec((tk_s, fout_pad), lambda m, k: (k, 0)),
                ],
                out_specs=pl.BlockSpec((tm_s, fout_pad), lambda m, k: (m, 0)),
                scratch_shapes=[pltpu.VMEM((tm_s, fout_pad), jnp.float32)],
            ),
            compiler_params=pltpu.CompilerParams(
                dimension_semantics=("parallel", "arbitrary"),
                vmem_limit_bytes=budget,
            ),
            cost_estimate=pl.CostEstimate(
                flops=2 * m_dim * fin_pad * fout_pad,
                transcendentals=0,
                bytes_accessed=(m_dim * fin_pad * x_bytes
                                + (m_dim // tm_s) * fin_pad * fout_pad * f32b
                                + m_dim * fout_pad * f32b),
            ),
        )(x2d, w_p)

    support = support2d.reshape(B, n_pad, fout_pad)

    # ---- kernel 2: out = adj @ support + bias ---------------------------------
    def fits_agg_fullk(tm):
        return 2 * (tm * n_pad * adj_bytes
                    + n_pad * fout_pad * f32b
                    + tm * fout_pad * out_bytes
                    + fout_pad * f32b) <= budget

    tm_a = _pick_tile(n_pad, fits_agg_fullk, extra_parallel=B, max_tile=1024)

    if tm_a is not None:
        out_p = pl.pallas_call(
            _aggregate_kernel,
            out_shape=jax.ShapeDtypeStruct((B, n_pad, fout_pad), out_dtype),
            grid_spec=pltpu.PrefetchScalarGridSpec(
                num_scalar_prefetch=0,
                grid=(B, n_pad // tm_a),
                in_specs=[
                    # TODO(synk): sweep pipeline_mode=pl.Buffered(3) on this adj
                    # spec if profiling shows exposed adj DMA after tiling.
                    pl.BlockSpec((1, tm_a, n_pad), lambda b, i: (b, i, 0)),
                    pl.BlockSpec((1, n_pad, fout_pad), lambda b, i: (b, 0, 0)),  # resident
                    pl.BlockSpec((1, fout_pad), lambda b, i: (0, 0)),
                ],
                out_specs=pl.BlockSpec((1, tm_a, fout_pad), lambda b, i: (b, i, 0)),
            ),
            compiler_params=pltpu.CompilerParams(
                dimension_semantics=("parallel", "parallel"),
                vmem_limit_bytes=budget,
            ),
            cost_estimate=pl.CostEstimate(
                flops=2 * B * n_pad * n_pad * fout_pad,
                transcendentals=0,
                bytes_accessed=(B * n_pad * n_pad * adj_bytes
                                + B * n_pad * fout_pad * f32b
                                + B * n_pad * fout_pad * out_bytes
                                + fout_pad * f32b),
            ),
        )(adj_p, support, b_p)
    else:
        # K-tiled fallback for very large n_pad (full-K adj block over budget).
        def fits_agg_kt(tm, tk):
            return (2 * (tm * tk * adj_bytes + tk * fout_pad * f32b
                         + tm * fout_pad * out_bytes + fout_pad * f32b)
                    + tm * fout_pad * f32b) <= budget

        tk_a = _pick_tile(n_pad, lambda t: fits_agg_kt(128, t),
                          extra_parallel=1, max_tile=8192) or 128
        tm_a = _pick_tile(n_pad, lambda t: fits_agg_kt(t, tk_a),
                          extra_parallel=B, max_tile=1024) or 128

        out_p = pl.pallas_call(
            _aggregate_kernel_ktiled,
            out_shape=jax.ShapeDtypeStruct((B, n_pad, fout_pad), out_dtype),
            grid_spec=pltpu.PrefetchScalarGridSpec(
                num_scalar_prefetch=0,
                grid=(B, n_pad // tm_a, n_pad // tk_a),
                in_specs=[
                    pl.BlockSpec((1, tm_a, tk_a), lambda b, i, k: (b, i, k)),
                    pl.BlockSpec((1, tk_a, fout_pad), lambda b, i, k: (b, k, 0)),
                    pl.BlockSpec((1, fout_pad), lambda b, i, k: (0, 0)),
                ],
                out_specs=pl.BlockSpec((1, tm_a, fout_pad),
                                       lambda b, i, k: (b, i, 0)),
                scratch_shapes=[pltpu.VMEM((tm_a, fout_pad), jnp.float32)],
            ),
            compiler_params=pltpu.CompilerParams(
                dimension_semantics=("parallel", "parallel", "arbitrary"),
                vmem_limit_bytes=budget,
            ),
            cost_estimate=pl.CostEstimate(
                flops=2 * B * n_pad * n_pad * fout_pad,
                transcendentals=0,
                bytes_accessed=(B * n_pad * n_pad * adj_bytes
                                + B * (n_pad // tm_a) * n_pad * fout_pad * f32b
                                + B * n_pad * fout_pad * out_bytes
                                + fout_pad * f32b),
            ),
        )(adj_p, support, b_p)

    if n_pad == N and fout_pad == Fout:
        return out_p
    return out_p[:, :N, :Fout]


if __name__ == "__main__":
    # Small shapes consistent with the module's forward.
    B, N = 2, 8           # batch, number of graph nodes
    Fin, Fout = 32, 16    # in_features, out_features

    key = jax.random.PRNGKey(0)
    kx, kadj, kw, kb = jax.random.split(key, 4)

    x = jax.random.normal(kx, (B, N, Fin), dtype=jnp.float32)
    adj = jax.random.uniform(kadj, (B, N, N), dtype=jnp.float32)

    # Deterministic parameter init matching reset_parameters():
    # uniform(-stdv, stdv) with stdv = 1/sqrt(out_features)
    stdv = 1.0 / math.sqrt(Fout)
    weight = jax.random.uniform(kw, (Fin, Fout), minval=-stdv, maxval=stdv,
                                dtype=jnp.float32)
    bias = jax.random.uniform(kb, (Fout,), minval=-stdv, maxval=stdv,
                              dtype=jnp.float32)

    gcn = jax.jit(graph_convolution)
    out = jax.block_until_ready(gcn(x, adj, weight, bias))
    assert out.shape == (B, N, Fout)
    assert out.dtype == x.dtype

    # Full f32 reference (PyTorch semantics).  Tolerance covers the backend's
    # default TPU matmul precision; the kernel itself does f32-in / f32-acc.
    ref = jnp.matmul(adj, jnp.matmul(x, weight)) + bias
    assert jnp.allclose(out, ref, atol=2e-2, rtol=2e-2), \
        "mismatch vs f32 reference"

    print("KERNEL_OK")
</pallas_src>

<mosaic_0001>
module attributes {stable_mosaic.version = 11 : i64} {
  func.func @_aggregate_kernel(%arg0: i32, %arg1: i32, %arg2: memref<1x128x128xf32, #tpu.memory_space<vmem>>, %arg3: memref<1x128x128xf32, #tpu.memory_space<vmem>>, %arg4: memref<1x128xf32, #tpu.memory_space<vmem>>, %arg5: memref<1x128x128xf32, #tpu.memory_space<vmem>>) attributes {dimension_semantics = [#tpu.dimension_semantics<parallel>, #tpu.dimension_semantics<parallel>], iteration_bounds = array<i64: 2, 1>, scalar_prefetch = 0 : i64, scratch_operands = 0 : i64, tpu.core_type = #tpu.core_type<tc>, window_params = [{transform_indices = @transform_0, window_bounds = array<i64: 1, 128, 128>}, {transform_indices = @transform_1, window_bounds = array<i64: 1, 128, 128>}, {pipeline_mode = #tpu.pipeline_mode<synchronous>, transform_indices = @transform_2, window_bounds = array<i64: 1, 128>}, {transform_indices = @transform_3, window_bounds = array<i64: 1, 128, 128>}]} {
    %c0 = arith.constant 0 : index
    %c0_0 = arith.constant 0 : index
    %c0_1 = arith.constant 0 : index
    %0 = vector.load %arg2[%c0, %c0_0, %c0_1] : memref<1x128x128xf32, #tpu.memory_space<vmem>>, vector<1x128x128xf32>
    %1 = vector.shape_cast %0 : vector<1x128x128xf32> to vector<128x128xf32>
    %c0_2 = arith.constant 0 : index
    %c0_3 = arith.constant 0 : index
    %c0_4 = arith.constant 0 : index
    %2 = vector.load %arg3[%c0_2, %c0_3, %c0_4] : memref<1x128x128xf32, #tpu.memory_space<vmem>>, vector<1x128x128xf32>
    %3 = vector.shape_cast %2 : vector<1x128x128xf32> to vector<128x128xf32>
    %cst = arith.constant dense<0.000000e+00> : vector<128x128xf32>
    %4 = tpu.matmul %1, %3, %cst {dimension_numbers = #tpu.dot_dimension_numbers<[1], [0], [0], [1], [0, 0, 1, 1], [], []>} : vector<128x128xf32>, vector<128x128xf32>, vector<128x128xf32> -> vector<128x128xf32>
    %c0_5 = arith.constant 0 : index
    %c0_6 = arith.constant 0 : index
    %5 = vector.load %arg4[%c0_5, %c0_6] : memref<1x128xf32, #tpu.memory_space<vmem>>, vector<1x128xf32>
    %6 = vector.broadcast %5 : vector<1x128xf32> to vector<128x128xf32>
    %7 = arith.addf %4, %6 : vector<128x128xf32>
    %c0_7 = arith.constant 0 : index
    %c0_8 = arith.constant 0 : index
    %c0_9 = arith.constant 0 : index
    %8 = vector.load %arg5[%c0_7, %c0_8, %c0_9] : memref<1x128x128xf32, #tpu.memory_space<vmem>>, vector<1x128x128xf32>
    %9 = vector.shape_cast %8 : vector<1x128x128xf32> to vector<128x128xf32>
    %10 = vector.shape_cast %7 : vector<128x128xf32> to vector<1x128x128xf32>
    tpu.vector_store %arg5[%c0_7, %c0_8, %c0_9], %10 {strides = array<i32>} : memref<1x128x128xf32, #tpu.memory_space<vmem>>, vector<1x128x128xf32>,
    return
  }
  func.func @transform_0(%arg0: i32, %arg1: i32) -> (i32, i32, i32) {
    %c0_i32 = arith.constant 0 : i32
    %c0_i32_0 = arith.constant 0 : i32
    return %arg0, %arg1, %c0_i32 : i32, i32, i32
  }
  func.func @transform_1(%arg0: i32, %arg1: i32) -> (i32, i32, i32) {
    %c0_i32 = arith.constant 0 : i32
    %c0_i32_0 = arith.constant 0 : i32
    %c0_i32_1 = arith.constant 0 : i32
    return %arg0, %c0_i32, %c0_i32_0 : i32, i32, i32
  }
  func.func @transform_2(%arg0: i32, %arg1: i32) -> (i32, i32) {
    %c0_i32 = arith.constant 0 : i32
    %c0_i32_0 = arith.constant 0 : i32
    %c0_i32_1 = arith.constant 0 : i32
    return %c0_i32, %c0_i32_0 : i32, i32
  }
  func.func @transform_3(%arg0: i32, %arg1: i32) -> (i32, i32, i32) {
    %c0_i32 = arith.constant 0 : i32
    %c0_i32_0 = arith.constant 0 : i32
    return %arg0, %arg1, %c0_i32 : i32, i32, i32
  }
}

module attributes {stable_mosaic.version = 11 : i64} {
  func.func @_support_kernel(%arg0: i32, %arg1: memref<128x128xf32, #tpu.memory_space<vmem>>, %arg2: memref<128x128xf32, #tpu.memory_space<vmem>>, %arg3: memref<128x128xf32, #tpu.memory_space<vmem>>) attributes {dimension_semantics = [#tpu.dimension_semantics<parallel>], iteration_bounds = array<i64: 2>, scalar_prefetch = 0 : i64, scratch_operands = 0 : i64, tpu.core_type = #tpu.core_type<tc>, window_params = [{transform_indices = @transform_0, window_bounds = array<i64: 128, 128>}, {pipeline_mode = #tpu.pipeline_mode<synchronous>, transform_indices = @transform_1, window_bounds = array<i64: 128, 128>}, {transform_indices = @transform_2, window_bounds = array<i64: 128, 128>}]} {
    %c0 = arith.constant 0 : index
    %c0_0 = arith.constant 0 : index
    %0 = vector.load %arg1[%c0, %c0_0] : memref<128x128xf32, #tpu.memory_space<vmem>>, vector<128x128xf32>
    %c0_1 = arith.constant 0 : index
    %c0_2 = arith.constant 0 : index
    %1 = vector.load %arg2[%c0_1, %c0_2] : memref<128x128xf32, #tpu.memory_space<vmem>>, vector<128x128xf32>
    %cst = arith.constant dense<0.000000e+00> : vector<128x128xf32>
    %2 = tpu.matmul %0, %1, %cst {dimension_numbers = #tpu.dot_dimension_numbers<[1], [0], [0], [1], [0, 0, 1, 1], [], []>} : vector<128x128xf32>, vector<128x128xf32>, vector<128x128xf32> -> vector<128x128xf32>
    %c0_3 = arith.constant 0 : index
    %c0_4 = arith.constant 0 : index
    %3 = vector.load %arg3[%c0_3, %c0_4] : memref<128x128xf32, #tpu.memory_space<vmem>>, vector<128x128xf32>
    tpu.vector_store %arg3[%c0_3, %c0_4], %2 {strides = array<i32>} : memref<128x128xf32, #tpu.memory_space<vmem>>, vector<128x128xf32>,
    return
  }
  func.func @transform_0(%arg0: i32) -> (i32, i32) {
    %c0_i32 = arith.constant 0 : i32
    %c0_i32_0 = arith.constant 0 : i32
    return %arg0, %c0_i32 : i32, i32
  }
  func.func @transform_1(%arg0: i32) -> (i32, i32) {
    %c0_i32 = arith.constant 0 : i32
    %c0_i32_0 = arith.constant 0 : i32
    %c0_i32_1 = arith.constant 0 : i32
    return %c0_i32, %c0_i32_0 : i32, i32
  }
  func.func @transform_2(%arg0: i32) -> (i32, i32) {
    %c0_i32 = arith.constant 0 : i32
    %c0_i32_0 = arith.constant 0 : i32
    return %arg0, %c0_i32 : i32, i32
  }
}

</mosaic_0001>

<bundles_post_ra>
// kernel: graph_convolution.2
= control target key start
LH: loop header
LB: loop body
LE: loop exit
PB: predicated region body
PF: predicated region fallthrough
CT: control target
= control target key end

     0   :  { %s574_s9 = smov 0   ;;  %s682_s0 = inlined_call_operand.vmem [shape: f32[256,128], index: 0, kind: input, shape index: {}]   ;;  %s683_s1 = inlined_call_operand.vmem [shape: f32[128,128], index: 1, kind: input, shape index: {}]   ;;  %s684_s2 = inlined_call_operand.vmem [shape: f32[256,128], index: 2, kind: output, shape index: {}]  }
   0x1 LB: > { %s396_s10 = sadd.s32 4294967295, %s557_s9   ;;  %p400_p0 = scmp.ge.s32.totalorder %s557_s9, 1  ;;  %s557_s9 = sphi %s574_s9, %s12_s9  }
   0x2   : > { %p113_p1 = scmp.lt.s32.totalorder %s557_s9, 3 }
   0x4   : > { %p114_p2 = pnand %p400_p0, %p113_p1 }
   0x5   : > { %v163_v0 = vld [vmem:[%s683_s1] sm:$0xff] (!%p114_p2)  ;;  %v164_v1 = vld [vmem:[%s683_s1 + $0x8] sm:$0xff] (!%p114_p2)  ;;  %v165_v2 = vld [vmem:[%s683_s1 + $0x10] sm:$0xff] (!%p114_p2)  ;;  %s401_s17 = sshll.u32 (!%p114_p2), %s396_s10, 4 }
   0x6   : > { %117 = sbr.rel (%p114_p2) target bundleno = 267 (0x10b), region = 28  ;;  %v495_v3 = vpack.c.bf16 (!%p114_p2), %v164_v1, %v163_v0  ;;  %v166_v4 = vld [vmem:[%s683_s1 + $0x18] sm:$0xff] (!%p114_p2)  ;;  %p136_p3 = scmp.lt.s32.totalorder (!%p114_p2), %s401_s17, 31  ;;  %v167_v6 = vld [vmem:[%s683_s1 + $0x20] sm:$0xff] (!%p114_p2)  ;;  %v168_v7 = vld [vmem:[%s683_s1 + $0x28] sm:$0xff] (!%p114_p2) }
   0x7   : > { %v499_v5 = vpack.c.bf16 (!%p114_p2), %v166_v4, %v165_v2  ;;  %v503_v8 = vpack.c.bf16 (!%p114_p2), %v168_v7, %v167_v6  ;;  %v169_v9 = vld [vmem:[%s683_s1 + $0x30] sm:$0xff] (!%p114_p2)  ;;  %v170_v10 = vld [vmem:[%s683_s1 + $0x38] sm:$0xff] (!%p114_p2)  ;;  %v171_v14 = vld [vmem:[%s683_s1 + $0x40] sm:$0xff] (!%p114_p2) }
   0x8   : > { %496 = vmatprep.subr.bf16.mxu0 (!%p114_p2), %v495_v3  ;;  %527 = vmatprep.subr.bf16.mxu1 (!%p114_p2), %v495_v3  ;;  %v507_v13 = vpack.c.bf16 (!%p114_p2), %v170_v10, %v169_v9  ;;  %v172_v15 = vld [vmem:[%s683_s1 + $0x48] sm:$0xff] (!%p114_p2)  ;;  %v173_v17 = vld [vmem:[%s683_s1 + $0x50] sm:$0xff] (!%p114_p2)  ;;  %v174_v18 = vld [vmem:[%s683_s1 + $0x58] sm:$0xff] (!%p114_p2) }
   0x9   : > { %498 = vmatpush3.bf16.msra.mxu0 (!%p114_p2), %v495_v3  ;;  %535 = vmatpush3.bf16.msra.mxu1 (!%p114_p2), %v495_v3  ;;  %v511_v16 = vpack.c.bf16 (!%p114_p2), %v172_v15, %v171_v14  ;;  %v515_v19 = vpack.c.bf16 (!%p114_p2), %v174_v18, %v173_v17  ;;  %v175_v20 = vld [vmem:[%s683_s1 + $0x60] sm:$0xff] (!%p114_p2)  ;;  %v176_v21 = vld [vmem:[%s683_s1 + $0x68] sm:$0xff] (!%p114_p2)  ;;  %v177_v23 = vld [vmem:[%s683_s1 + $0x70] sm:$0xff] (!%p114_p2) }
   0xa   : > { %500 = vmatprep.subr.bf16.mxu0 (!%p114_p2), %v499_v5  ;;  %528 = vmatprep.subr.bf16.mxu1 (!%p114_p2), %v499_v5  ;;  %v519_v22 = vpack.c.bf16 (!%p114_p2), %v176_v21, %v175_v20  ;;  %v178_v24 = vld [vmem:[%s683_s1 + $0x78] sm:$0xff] (!%p114_p2) }
   0xb   : > { %v523_v25 = vpack.c.bf16 (!%p114_p2), %v178_v24, %v177_v23 }
   0xd   : > { %s686_s17 = smov (!%p136_p3, %s401_s17), 31  ;;  %502 = vmatpush3.bf16.msra.mxu0 %v499_v5  ;;  %536 = vmatpush3.bf16.msra.mxu1 %v499_v5 }
   0xe   : > { %s402_s24 = sshll.u32 %s686_s17, 3  ;;  %504 = vmatprep.subr.bf16.mxu0 %v503_v8  ;;  %529 = vmatprep.subr.bf16.mxu1 %v503_v8 }
   0xf   : > { %s614_s3 = scalar_lea.vmem %s682_s0, %s402_s24  ;;  %s661_s25 = scalar_lea.vmem %s684_s2, %s402_s24 }
  0x10   : > { %v147_v11 = vld [vmem:[%s614_s3] sm:$0xff]  ;;  %v148_v26 = vld [vmem:[%s614_s3 + $0x8] sm:$0xff]  ;;  %v149_v28 = vld [vmem:[%s614_s3 + $0x10] sm:$0xff] }
  0x11   : > { %v155_v12 = vld [vmem:[%s614_s3 + $0x40] sm:$0xff]  ;;  %471 = vmatprep.mubr.f32.mxu0 %v147_v11  ;;  %506 = vmatpush3.bf16.msra.mxu0 %v503_v8  ;;  %v156_v27 = vld [vmem:[%s614_s3 + $0x48] sm:$0xff]  ;;  %v157_v29 = vld [vmem:[%s614_s3 + $0x50] sm:$0xff] }
  0x12   : > { %483 = vmatprep.mubr.f32.mxu1 %v155_v12  ;;  %537 = vmatpush3.bf16.msra.mxu1 %v503_v8  ;;  %v150_v30 = vld [vmem:[%s614_s3 + $0x18] sm:$0xff]  ;;  %v151_v32 = vld [vmem:[%s614_s3 + $0x20] sm:$0xff]  ;;  %v152_v34 = vld [vmem:[%s614_s3 + $0x28] sm:$0xff] }
  0x13   : > { %508 = vmatprep.subr.bf16.mxu0 %v507_v13  ;;  %530 = vmatprep.subr.bf16.mxu1 %v507_v13  ;;  %v158_v31 = vld [vmem:[%s614_s3 + $0x58] sm:$0xff]  ;;  %v159_v33 = vld [vmem:[%s614_s3 + $0x60] sm:$0xff]  ;;  %v160_v35 = vld [vmem:[%s614_s3 + $0x68] sm:$0xff] }
  0x14   : > { %v153_v36 = vld [vmem:[%s614_s3 + $0x30] sm:$0xff]  ;;  %v154_v38 = vld [vmem:[%s614_s3 + $0x38] sm:$0xff] }
  0x15   : > { %510 = vmatpush3.bf16.msra.mxu0 %v507_v13  ;;  %v161_v37 = vld [vmem:[%s614_s3 + $0x70] sm:$0xff]  ;;  %v162_v39 = vld [vmem:[%s614_s3 + $0x78] sm:$0xff] }
  0x16   : > { %538 = vmatpush3.bf16.msra.mxu1 %v507_v13  ;;  %512 = vmatprep.subr.bf16.mxu0 %v511_v16 }
  0x17   : > { %531 = vmatprep.subr.bf16.mxu1 %v511_v16 }
  0x19   : > { %514 = vmatpush3.bf16.msra.mxu0 %v511_v16 }
  0x1a   : > { %539 = vmatpush3.bf16.msra.mxu1 %v511_v16  ;;  %516 = vmatprep.subr.bf16.mxu0 %v515_v19 }
  0x1b   : > { %532 = vmatprep.subr.bf16.mxu1 %v515_v19 }
  0x1d   : > { %518 = vmatpush3.bf16.msra.mxu0 %v515_v19 }
  0x1e   : > { %540 = vmatpush3.bf16.msra.mxu1 %v515_v19  ;;  %520 = vmatprep.subr.bf16.mxu0 %v519_v22 }
  0x1f   : > { %533 = vmatprep.subr.bf16.mxu1 %v519_v22 }
  0x21   : > { %522 = vmatpush3.bf16.msra.mxu0 %v519_v22 }
  0x22   : > { %541 = vmatpush3.bf16.msra.mxu1 %v519_v22  ;;  %524 = vmatprep.subr.bf16.mxu0 %v523_v25 }
  0x23   : > { %534 = vmatprep.subr.bf16.mxu1 %v523_v25 }
  0x25   : > { %526 = vmatpush3.bf16.msra.mxu0 %v523_v25 }
  0x26   : > { %542 = vmatpush3.bf16.msra.mxu1 %v523_v25 }
  0x28   : > { %472 = vmatmul.mubr.f32.vlgmr.msra.gmra.mrb[0].mxu0 %v148_v26 }
  0x29   : > { %484 = vmatmul.mubr.f32.vlgmr.msra.gmra.mrb[0].mxu1 %v156_v27  ;;  %474 = vmatprep.mubr.f32.mxu0 %v149_v28 }
  0x2a   : > { %486 = vmatprep.mubr.f32.mxu1 %v157_v29 }
  0x2c   : > { %475 = vmatmul.mubr.f32.gmra.mrb[2].mxu0 %v150_v30 }
  0x2d   : > { %487 = vmatmul.mubr.f32.gmra.mrb[2].mxu1 %v158_v31  ;;  %477 = vmatprep.mubr.f32.mxu0 %v151_v32 }
  0x2e   : > { %489 = vmatprep.mubr.f32.mxu1 %v159_v33 }
  0x30   : > { %478 = vmatmul.mubr.f32.gmra.mrb[4].mxu0 %v152_v34 }
  0x31   : > { %490 = vmatmul.mubr.f32.gmra.mrb[4].mxu1 %v160_v35  ;;  %480 = vmatprep.mubr.f32.mxu0 %v153_v36 }
  0x32   : > { %492 = vmatprep.mubr.f32.mxu1 %v161_v37 }
  0x34   : > { %481 = vmatmul.mubr.f32.gmra.mrb[6].mxu0 %v154_v38 }
  0x35   : > { %493 = vmatmul.mubr.f32.gmra.mrb[6].mxu1 %v162_v39 }
  0xfb   : > { %v473_v40 = vpop.f32.mrb[0].mxu0 }
  0xfc   : > { %v485_v41 = vpop.f32.mrb[0].mxu1  ;;  %325 = vst [vmem:[%s661_s25 + $0x8] sm:$0xff] %v473_v40  ;;  %v245_v42 = vpop.f32.mrb[1].mxu0 }
  0xfd   : > { %333 = vst [vmem:[%s661_s25 + $0x48] sm:$0xff] %v485_v41  ;;  %v285_v43 = vpop.f32.mrb[1].mxu1  ;;  %324 = vst [vmem:[%s661_s25] sm:$0xff] %v245_v42 }
  0xfe   : > { %332 = vst [vmem:[%s661_s25 + $0x40] sm:$0xff] %v285_v43 }
  0xff   : > { %v476_v44 = vpop.f32.mrb[2].mxu0 }
 0x100   : > { %v488_v45 = vpop.f32.mrb[2].mxu1  ;;  %327 = vst [vmem:[%s661_s25 + $0x18] sm:$0xff] %v476_v44  ;;  %v255_v46 = vpop.f32.mrb[3].mxu0 }
 0x101   : > { %335 = vst [vmem:[%s661_s25 + $0x58] sm:$0xff] %v488_v45  ;;  %v295_v47 = vpop.f32.mrb[3].mxu1  ;;  %326 = vst [vmem:[%s661_s25 + $0x10] sm:$0xff] %v255_v46 }
 0x102   : > { %334 = vst [vmem:[%s661_s25 + $0x50] sm:$0xff] %v295_v47 }
 0x103   : > { %v479_v48 = vpop.f32.mrb[4].mxu0 }
 0x104   : > { %v491_v49 = vpop.f32.mrb[4].mxu1  ;;  %329 = vst [vmem:[%s661_s25 + $0x28] sm:$0xff] %v479_v48  ;;  %v265_v50 = vpop.f32.mrb[5].mxu0 }
 0x105   : > { %337 = vst [vmem:[%s661_s25 + $0x68] sm:$0xff] %v491_v49  ;;  %v305_v51 = vpop.f32.mrb[5].mxu1  ;;  %328 = vst [vmem:[%s661_s25 + $0x20] sm:$0xff] %v265_v50 }
 0x106   : > { %336 = vst [vmem:[%s661_s25 + $0x60] sm:$0xff] %v305_v51 }
 0x107   : > { %v482_v52 = vpop.f32.mrb[6].mxu0 }
 0x108   : > { %v494_v53 = vpop.f32.mrb[6].mxu1  ;;  %331 = vst [vmem:[%s661_s25 + $0x38] sm:$0xff] %v482_v52  ;;  %v275_v54 = vpop.f32.mrb[7].mxu0 }
 0x109   : > { %339 = vst [vmem:[%s661_s25 + $0x78] sm:$0xff] %v494_v53  ;;  %v315_v55 = vpop.f32.mrb[7].mxu1  ;;  %330 = vst [vmem:[%s661_s25 + $0x30] sm:$0xff] %v275_v54 }
 0x10a   : > { %338 = vst [vmem:[%s661_s25 + $0x70] sm:$0xff] %v315_v55 }
 0x10b PF: > { %s12_s9 = sadd.s32 1, %s557_s9  }
 0x10c   : > { %p9_p4 = scmp.ge.s32.totalorder %s12_s9, 4  }
 0x10e   :  { %11 = sbr.rel (!%p9_p4) target bundleno = 1 (0x1), region = 58 }

// kernel: graph_convolution.3
= control target key start
LH: loop header
LB: loop body
LE: loop exit
PB: predicated region body
PF: predicated region fallthrough
CT: control target
= control target key end

     0   :  { %s750_s12 = smov 0   ;;  %s752_s13 = smov 0   ;;  %s848_s0 = inlined_call_operand.vmem [shape: f32[2,128,128], index: 0, kind: input, shape index: {}]   ;;  %s849_s1 = inlined_call_operand.vmem [shape: f32[2,128,128], index: 1, kind: input, shape index: {}]   ;;  %s850_s2 = inlined_call_operand.vmem [shape: f32[1,128], index: 2, kind: input, shape index: {}]   ;;  %s851_s3 = inlined_call_operand.vmem [shape: f32[2,128,128], index: 3, kind: output, shape index: {}]  }
   0x1   :  { %s754_s14 = smov 0  }
   0x2 LB: > { %s25_s15 = sadd.s32 1, %s724_s13  ;;  %p533_p0 = scmp.ge.s32.totalorder %s728_s14, 1  ;;  %s728_s14 = sphi %s754_s14, %s13_s14   ;;  %s724_s13 = sphi %s752_s13, %s853_s13   ;;  %s720_s12 = sphi %s750_s12, %s852_s12  }
   0x3   : > { %p27_p1 = scmp.ge.s32.totalorder %s25_s15, 2  ;;  %p168_p2 = scmp.lt.s32.totalorder %s728_s14, 3 }
   0x5   : > { %s855_s15 = smov (%p27_p1, %s25_s15), 0  ;;  %p169_p3 = pnand %p533_p0, %p168_p2 }
   0x6   : > { %p206_p4 = scmp.lt.s32.totalorder (!%p169_p3), %s720_s12, 1  ;;  %v540_v40 = vld [vmem:[%s850_s2] ss:$0 sm:$0xff] (!%p169_p3) }
   0x7   : > { %172 = sbr.rel (%p169_p3) target bundleno = 280 (0x118), region = 32 }
   0xe   : > { %s857_s12 = smov (!%p206_p4, %s720_s12), 1 }
   0xf   : > { %s768_s16 = sshll.u32 %s857_s12, 7 }
  0x10   : > { %s774_s19 = scalar_lea.vmem %s849_s1, %s768_s16  ;;  %s786_s22 = scalar_lea.vmem %s848_s0, %s768_s16 }
  0x11   : > { %v246_v0 = vld [vmem:[%s774_s19] sm:$0xff]  ;;  %v247_v1 = vld [vmem:[%s774_s19 + $0x8] sm:$0xff]  ;;  %v248_v2 = vld [vmem:[%s774_s19 + $0x10] sm:$0xff]  ;;  %s821_s27 = scalar_lea.vmem %s851_s3, %s768_s16 }
  0x12   : > { %v634_v3 = vpack.c.bf16 %v247_v1, %v246_v0  ;;  %v249_v4 = vld [vmem:[%s774_s19 + $0x18] sm:$0xff]  ;;  %v250_v6 = vld [vmem:[%s774_s19 + $0x20] sm:$0xff]  ;;  %v251_v7 = vld [vmem:[%s774_s19 + $0x28] sm:$0xff] }
  0x13   : > { %v638_v5 = vpack.c.bf16 %v249_v4, %v248_v2  ;;  %v642_v8 = vpack.c.bf16 %v251_v7, %v250_v6  ;;  %v230_v9 = vld [vmem:[%s786_s22] sm:$0xff]  ;;  %v252_v11 = vld [vmem:[%s774_s19 + $0x30] sm:$0xff]  ;;  %v253_v12 = vld [vmem:[%s774_s19 + $0x38] sm:$0xff] }
  0x14   : > { %635 = vmatprep.subr.bf16.mxu0 %v634_v3  ;;  %666 = vmatprep.subr.bf16.mxu1 %v634_v3  ;;  %v238_v10 = vld [vmem:[%s786_s22 + $0x40] sm:$0xff]  ;;  %v646_v13 = vpack.c.bf16 %v253_v12, %v252_v11  ;;  %v255_v15 = vld [vmem:[%s774_s19 + $0x48] sm:$0xff]  ;;  %v256_v17 = vld [vmem:[%s774_s19 + $0x50] sm:$0xff] }
  0x15   : > { %637 = vmatpush3.bf16.msra.mxu0 %v634_v3  ;;  %674 = vmatpush3.bf16.msra.mxu1 %v634_v3  ;;  %v254_v14 = vld [vmem:[%s774_s19 + $0x40] sm:$0xff]  ;;  %v257_v18 = vld [vmem:[%s774_s19 + $0x58] sm:$0xff]  ;;  %v259_v21 = vld [vmem:[%s774_s19 + $0x68] sm:$0xff] }
  0x16   : > { %639 = vmatprep.subr.bf16.mxu0 %v638_v5  ;;  %667 = vmatprep.subr.bf16.mxu1 %v638_v5  ;;  %v650_v16 = vpack.c.bf16 %v255_v15, %v254_v14  ;;  %v654_v19 = vpack.c.bf16 %v257_v18, %v256_v17  ;;  %v258_v20 = vld [vmem:[%s774_s19 + $0x60] sm:$0xff]  ;;  %v260_v23 = vld [vmem:[%s774_s19 + $0x70] sm:$0xff]  ;;  %v261_v24 = vld [vmem:[%s774_s19 + $0x78] sm:$0xff] }
  0x17   : > { %610 = vmatprep.mubr.f32.mxu0 %v230_v9  ;;  %622 = vmatprep.mubr.f32.mxu1 %v238_v10  ;;  %v658_v22 = vpack.c.bf16 %v259_v21, %v258_v20  ;;  %v662_v25 = vpack.c.bf16 %v261_v24, %v260_v23  ;;  %v231_v26 = vld [vmem:[%s786_s22 + $0x8] sm:$0xff]  ;;  %v232_v28 = vld [vmem:[%s786_s22 + $0x10] sm:$0xff]  ;;  %v233_v30 = vld [vmem:[%s786_s22 + $0x18] sm:$0xff] }
  0x18   : > { %v239_v27 = vld [vmem:[%s786_s22 + $0x48] sm:$0xff]  ;;  %v240_v29 = vld [vmem:[%s786_s22 + $0x50] sm:$0xff]  ;;  %v241_v31 = vld [vmem:[%s786_s22 + $0x58] sm:$0xff] }
  0x19   : > { %641 = vmatpush3.bf16.msra.mxu0 %v638_v5  ;;  %675 = vmatpush3.bf16.msra.mxu1 %v638_v5  ;;  %v234_v32 = vld [vmem:[%s786_s22 + $0x20] sm:$0xff]  ;;  %v235_v34 = vld [vmem:[%s786_s22 + $0x28] sm:$0xff]  ;;  %v236_v36 = vld [vmem:[%s786_s22 + $0x30] sm:$0xff] }
  0x1a   : > { %643 = vmatprep.subr.bf16.mxu0 %v642_v8  ;;  %668 = vmatprep.subr.bf16.mxu1 %v642_v8  ;;  %v242_v33 = vld [vmem:[%s786_s22 + $0x60] sm:$0xff]  ;;  %v243_v35 = vld [vmem:[%s786_s22 + $0x68] sm:$0xff]  ;;  %v244_v37 = vld [vmem:[%s786_s22 + $0x70] sm:$0xff] }
  0x1b   : > { %v237_v38 = vld [vmem:[%s786_s22 + $0x38] sm:$0xff] }
  0x1c   : > { %v245_v39 = vld [vmem:[%s786_s22 + $0x78] sm:$0xff] }
  0x1d   : > { %645 = vmatpush3.bf16.msra.mxu0 %v642_v8  ;;  %676 = vmatpush3.bf16.msra.mxu1 %v642_v8 }
  0x1e   : > { %647 = vmatprep.subr.bf16.mxu0 %v646_v13  ;;  %669 = vmatprep.subr.bf16.mxu1 %v646_v13 }
  0x21   : > { %649 = vmatpush3.bf16.msra.mxu0 %v646_v13  ;;  %677 = vmatpush3.bf16.msra.mxu1 %v646_v13 }
  0x22   : > { %651 = vmatprep.subr.bf16.mxu0 %v650_v16  ;;  %670 = vmatprep.subr.bf16.mxu1 %v650_v16 }
  0x25   : > { %653 = vmatpush3.bf16.msra.mxu0 %v650_v16  ;;  %678 = vmatpush3.bf16.msra.mxu1 %v650_v16 }
  0x26   : > { %655 = vmatprep.subr.bf16.mxu0 %v654_v19  ;;  %671 = vmatprep.subr.bf16.mxu1 %v654_v19 }
  0x29   : > { %657 = vmatpush3.bf16.msra.mxu0 %v654_v19  ;;  %679 = vmatpush3.bf16.msra.mxu1 %v654_v19 }
  0x2a   : > { %659 = vmatprep.subr.bf16.mxu0 %v658_v22  ;;  %672 = vmatprep.subr.bf16.mxu1 %v658_v22 }
  0x2d   : > { %661 = vmatpush3.bf16.msra.mxu0 %v658_v22  ;;  %680 = vmatpush3.bf16.msra.mxu1 %v658_v22 }
  0x2e   : > { %663 = vmatprep.subr.bf16.mxu0 %v662_v25  ;;  %673 = vmatprep.subr.bf16.mxu1 %v662_v25 }
  0x31   : > { %665 = vmatpush3.bf16.msra.mxu0 %v662_v25  ;;  %681 = vmatpush3.bf16.msra.mxu1 %v662_v25 }
  0x34   : > { %611 = vmatmul.mubr.f32.vlgmr.msra.gmra.mrb[0].mxu0 %v231_v26  ;;  %623 = vmatmul.mubr.f32.vlgmr.msra.gmra.mrb[0].mxu1 %v239_v27 }
  0x35   : > { %613 = vmatprep.mubr.f32.mxu0 %v232_v28  ;;  %625 = vmatprep.mubr.f32.mxu1 %v240_v29 }
  0x38   : > { %614 = vmatmul.mubr.f32.gmra.mrb[2].mxu0 %v233_v30  ;;  %626 = vmatmul.mubr.f32.gmra.mrb[2].mxu1 %v241_v31 }
  0x39   : > { %616 = vmatprep.mubr.f32.mxu0 %v234_v32  ;;  %628 = vmatprep.mubr.f32.mxu1 %v242_v33 }
  0x3c   : > { %617 = vmatmul.mubr.f32.gmra.mrb[4].mxu0 %v235_v34  ;;  %629 = vmatmul.mubr.f32.gmra.mrb[4].mxu1 %v243_v35 }
  0x3d   : > { %619 = vmatprep.mubr.f32.mxu0 %v236_v36  ;;  %631 = vmatprep.mubr.f32.mxu1 %v244_v37 }
  0x40   : > { %620 = vmatmul.mubr.f32.gmra.mrb[6].mxu0 %v237_v38  ;;  %632 = vmatmul.mubr.f32.gmra.mrb[6].mxu1 %v245_v39 }
 0x107   : > { %v612_v41 = vpop.f32.mrb[0].mxu0  ;;  %v624_v42 = vpop.f32.mrb[0].mxu1 }
 0x108   : > { %v341_v43 = vadd.f32 %v612_v41, %v540_v40  ;;  %v381_v44 = vadd.f32 %v624_v42, %v540_v40  ;;  %v335_v45 = vpop.f32.mrb[1].mxu0  ;;  %v375_v46 = vpop.f32.mrb[1].mxu1 }
 0x109   : > { %v336_v47 = vadd.f32 %v540_v40, %v335_v45  ;;  %v376_v48 = vadd.f32 %v540_v40, %v375_v46 }
 0x10a   : > { %415 = vst [vmem:[%s821_s27 + $0x8] sm:$0xff] %v341_v43  ;;  %423 = vst [vmem:[%s821_s27 + $0x48] sm:$0xff] %v381_v44 }
 0x10b   : > { %414 = vst [vmem:[%s821_s27] sm:$0xff] %v336_v47  ;;  %422 = vst [vmem:[%s821_s27 + $0x40] sm:$0xff] %v376_v48  ;;  %v615_v49 = vpop.f32.mrb[2].mxu0  ;;  %v627_v50 = vpop.f32.mrb[2].mxu1 }
 0x10c   : > { %v351_v51 = vadd.f32 %v615_v49, %v540_v40  ;;  %v391_v52 = vadd.f32 %v627_v50, %v540_v40  ;;  %v345_v53 = vpop.f32.mrb[3].mxu0  ;;  %v385_v54 = vpop.f32.mrb[3].mxu1 }
 0x10d   : > { %v346_v55 = vadd.f32 %v540_v40, %v345_v53  ;;  %v386_v56 = vadd.f32 %v540_v40, %v385_v54 }
 0x10e   : > { %417 = vst [vmem:[%s821_s27 + $0x18] sm:$0xff] %v351_v51  ;;  %425 = vst [vmem:[%s821_s27 + $0x58] sm:$0xff] %v391_v52 }
 0x10f   : > { %416 = vst [vmem:[%s821_s27 + $0x10] sm:$0xff] %v346_v55  ;;  %424 = vst [vmem:[%s821_s27 + $0x50] sm:$0xff] %v386_v56  ;;  %v618_v57 = vpop.f32.mrb[4].mxu0  ;;  %v630_v58 = vpop.f32.mrb[4].mxu1 }
 0x110   : > { %v361_v59 = vadd.f32 %v618_v57, %v540_v40  ;;  %v401_v60 = vadd.f32 %v630_v58, %v540_v40  ;;  %v355_v61 = vpop.f32.mrb[5].mxu0  ;;  %v395_v62 = vpop.f32.mrb[5].mxu1 }
 0x111   : > { %v356_v63 = vadd.f32 %v540_v40, %v355_v61  ;;  %v396_v0 = vadd.f32 %v540_v40, %v395_v62 }
 0x112   : > { %419 = vst [vmem:[%s821_s27 + $0x28] sm:$0xff] %v361_v59  ;;  %427 = vst [vmem:[%s821_s27 + $0x68] sm:$0xff] %v401_v60 }
 0x113   : > { %418 = vst [vmem:[%s821_s27 + $0x20] sm:$0xff] %v356_v63  ;;  %426 = vst [vmem:[%s821_s27 + $0x60] sm:$0xff] %v396_v0  ;;  %v621_v1 = vpop.f32.mrb[6].mxu0  ;;  %v633_v2 = vpop.f32.mrb[6].mxu1 }
 0x114   : > { %v371_v3 = vadd.f32 %v621_v1, %v540_v40  ;;  %v411_v4 = vadd.f32 %v633_v2, %v540_v40  ;;  %v365_v5 = vpop.f32.mrb[7].mxu0  ;;  %v405_v6 = vpop.f32.mrb[7].mxu1 }
 0x115   : > { %v366_v7 = vadd.f32 %v540_v40, %v365_v5  ;;  %v406_v8 = vadd.f32 %v540_v40, %v405_v6 }
 0x116   : > { %421 = vst [vmem:[%s821_s27 + $0x38] sm:$0xff] %v371_v3  ;;  %429 = vst [vmem:[%s821_s27 + $0x78] sm:$0xff] %v411_v4 }
 0x117   : > { %420 = vst [vmem:[%s821_s27 + $0x30] sm:$0xff] %v366_v7  ;;  %428 = vst [vmem:[%s821_s27 + $0x70] sm:$0xff] %v406_v8 }
 0x118 PF: > { %s13_s14 = sadd.s32 1, %s728_s14   ;;  %s852_s12 = smov %s724_s13 }
 0x119   : > { %p10_p5 = scmp.ge.s32.totalorder %s13_s14, 4   ;;  %s853_s13 = smov %s855_s15 }
 0x11b   :  { %12 = sbr.rel (!%p10_p5) target bundleno = 2 (0x2), region = 65 }

</bundles_post_ra>
